<compile_context>
chip_gen: v7x
topology: tpu7x:2x2x1
jax: 0.10.0
libtpu: 0.0.40
codegen_flags: <defaults>
</compile_context>

<pallas_src>
import functools

import jax
import jax.numpy as jnp
import numpy as np
from jax import lax
from jax.experimental import pallas as pl
from jax.experimental.pallas import tpu as pltpu


def _attention1d_kernel(x_ref, wqkv_ref, wout_ref, bias_ref, o_ref, oh_ref,
                        *, heads, dim_head, scale):
    B, C, N = x_ref.shape
    hd = heads * dim_head

    w_qkv = wqkv_ref[...]          # (C, 3*H*D)  pre-transposed once at param-prep time
    w_out = wout_ref[...]          # (C, H*D)    native conv-weight layout (no transpose)
    bias = bias_ref[...]           # (C, 1)

    for b in range(B):             # static unroll, B == 2
        x_cn = x_ref[b]            # (C, N): native channel-first tile, no wrapper transpose
        # Fused QKV projection for all heads: contract the channel axis of both
        # operands.  (C, N) x (C, 3*H*D) -> (N, 3*H*D), lane-dense hidden axis.
        qkv = lax.dot_general(x_cn, w_qkv, (((0,), (0,)), ((), ())),
                              preferred_element_type=jnp.float32)       # (N, 3*H*D)

        # q/k/v splits land exactly on 128-lane boundaries (H*D == 128).
        q = qkv[:, :hd]
        k = qkv[:, hd:2 * hd]
        v = qkv[:, 2 * hd:]

        for h in range(heads):     # static unroll, heads == 4
            sl = slice(h * dim_head, (h + 1) * dim_head)
            qh, kh, vh = q[:, sl], k[:, sl], v[:, sl]                    # (N, D) each

            # sim[i, j] = scale * sum_d q[i, d] * k[j, d]
            sim = lax.dot_general(qh, kh, (((1,), (1,)), ((), ())),
                                  preferred_element_type=jnp.float32) * scale
            sim = sim - jnp.max(sim, axis=-1, keepdims=True)
            p = jnp.exp(sim)
            attn = p / jnp.sum(p, axis=-1, keepdims=True)                # exact softmax

            oh = jnp.dot(attn, vh, preferred_element_type=jnp.float32)   # (N, D)
            # Stage this head's output in its 32-lane slice of the fused
            # (B*N, H*D) scratch so the output projection is one K=128 matmul.
            oh_ref[b * N:(b + 1) * N, h * dim_head:(h + 1) * dim_head] = oh

    # Fused output projection for all heads AND both batch elements:
    # (C, H*D) x (B*N, H*D) contracting H*D -> (C, B*N), i.e. directly in the
    # channel-first layout the output wants.  Bias added once in the epilogue.
    out_all = lax.dot_general(w_out, oh_ref[...], (((1,), (1,)), ((), ())),
                              preferred_element_type=jnp.float32)        # (C, B*N)
    out_all = out_all + bias
    for b in range(B):
        o_ref[b] = out_all[:, b * N:(b + 1) * N].astype(o_ref.dtype)


def prepare_attention1d_params(w_qkv, w_out, b_out):
    """One-time parameter layout prep (NOT in the per-call path).

    w_qkv: (3*H*D, C) kernel-size-1 Conv1d weight, squeezed.
    w_out: (C, H*D)   kernel-size-1 Conv1d weight, squeezed (kept native).
    b_out: (C,)       Conv1d bias.
    """
    return w_qkv.T, w_out, b_out.reshape(-1, 1)


def attention1d_pallas(x, w_qkv_t, w_out, bias_col, *, heads, dim_head):
    """x: (B, C, N) f32, native channel-first layout. Params from
    prepare_attention1d_params. Returns (B, C, N) f32."""
    B, C, N = x.shape
    hd = heads * dim_head
    scale = dim_head ** (-0.5)

    kernel = functools.partial(_attention1d_kernel,
                               heads=heads, dim_head=dim_head, scale=scale)

    return pl.pallas_call(
        kernel,
        out_shape=jax.ShapeDtypeStruct((B, C, N), jnp.float32),
        grid=(1,),                                              # single kernel invocation
        in_specs=[
            pl.BlockSpec((B, C, N), lambda i: (0, 0, 0)),       # x, native layout
            pl.BlockSpec((C, 3 * hd), lambda i: (0, 0)),        # fused QKV weight (C, 3HD)
            pl.BlockSpec((C, hd), lambda i: (0, 0)),            # output weight (C, HD)
            pl.BlockSpec((C, 1), lambda i: (0, 0)),             # bias column
        ],
        out_specs=pl.BlockSpec((B, C, N), lambda i: (0, 0, 0)),
        scratch_shapes=[pltpu.VMEM((B * N, hd), jnp.float32)],  # fused head-output staging
        compiler_params=pltpu.CompilerParams(
            dimension_semantics=("arbitrary",)),
    )(x, w_qkv_t, w_out, bias_col)


def attention1d_ref(x, w_qkv, w_out, b_out, *, heads, dim_head):
    """Pure-JAX reference matching the PyTorch forward pass (native weights)."""
    B, C, N = x.shape
    hidden = heads * dim_head
    scale = dim_head ** (-0.5)
    qkv = jnp.einsum('oc,bcn->bon', w_qkv, x)
    q, k, v = qkv[:, :hidden], qkv[:, hidden:2 * hidden], qkv[:, 2 * hidden:]
    r = lambda t: t.reshape(B, heads, dim_head, N)
    q, k, v = r(q) * scale, r(k), r(v)
    sim = jnp.einsum('bhdi,bhdj->bhij', q, k)
    attn = jax.nn.softmax(sim, axis=-1)
    out = jnp.einsum('bhij,bhdj->bhid', attn, v)            # (B, H, N, D)
    out = out.transpose(0, 1, 3, 2).reshape(B, hidden, N)   # 'b h n d -> b (h d) n'
    return jnp.einsum('oc,bcn->bon', w_out, out) + b_out[None, :, None]


if __name__ == "__main__":
    # Shapes consistent with the module: dim (channels) = 8, length = 16.
    B, dim, N = 2, 8, 16
    heads, dim_head = 4, 32
    hidden = heads * dim_head

    key = jax.random.PRNGKey(0)
    kx, kqkv, kwo, kbo = jax.random.split(key, 4)

    x = jax.random.normal(kx, (B, dim, N), dtype=jnp.float32)
    # Deterministic synthetic parameters (Conv1d kernel-size-1 weights, squeezed).
    w_qkv = jax.random.normal(kqkv, (3 * hidden, dim), dtype=jnp.float32) * 0.1
    w_out = jax.random.normal(kwo, (dim, hidden), dtype=jnp.float32) * 0.1
    b_out = jax.random.normal(kbo, (dim,), dtype=jnp.float32) * 0.1

    # One-time parameter layout prep (outside the per-call path).
    w_qkv_t, w_out_k, bias_col = prepare_attention1d_params(w_qkv, w_out, b_out)

    y = attention1d_pallas(x, w_qkv_t, w_out_k, bias_col,
                           heads=heads, dim_head=dim_head)
    y = jax.block_until_ready(y)

    y_ref = attention1d_ref(x, w_qkv, w_out, b_out, heads=heads, dim_head=dim_head)
    # Softmax is exact; the tolerance covers the platform-default MXU precision
    # for f32 matmuls (single-pass bf16 multiplies, f32 accumulation) relative to
    # the XLA einsum reference.
    np.testing.assert_allclose(np.asarray(y), np.asarray(y_ref), rtol=2e-3, atol=2e-3)

    print("KERNEL_OK")
</pallas_src>

<mosaic_0001>
module attributes {stable_mosaic.version = 11 : i64} {
  func.func @_attention1d_kernel(%arg0: i32, %arg1: memref<2x8x16xf32, #tpu.memory_space<vmem>>, %arg2: memref<8x384xf32, #tpu.memory_space<vmem>>, %arg3: memref<8x128xf32, #tpu.memory_space<vmem>>, %arg4: memref<8x1xf32, #tpu.memory_space<vmem>>, %arg5: memref<2x8x16xf32, #tpu.memory_space<vmem>>, %arg6: memref<32x128xf32, #tpu.memory_space<vmem>>) attributes {dimension_semantics = [#tpu.dimension_semantics<arbitrary>], iteration_bounds = array<i64: 1>, scalar_prefetch = 0 : i64, scratch_operands = 1 : i64, tpu.core_type = #tpu.core_type<tc>, window_params = [{pipeline_mode = #tpu.pipeline_mode<synchronous>, transform_indices = @transform_0, window_bounds = array<i64: 2, 8, 16>}, {pipeline_mode = #tpu.pipeline_mode<synchronous>, transform_indices = @transform_1, window_bounds = array<i64: 8, 384>}, {pipeline_mode = #tpu.pipeline_mode<synchronous>, transform_indices = @transform_2, window_bounds = array<i64: 8, 128>}, {pipeline_mode = #tpu.pipeline_mode<synchronous>, transform_indices = @transform_3, window_bounds = array<i64: 8, 1>}, {pipeline_mode = #tpu.pipeline_mode<synchronous>, transform_indices = @transform_4, window_bounds = array<i64: 2, 8, 16>}]} {
    %c0 = arith.constant 0 : index
    %c0_0 = arith.constant 0 : index
    %0 = vector.load %arg2[%c0, %c0_0] : memref<8x384xf32, #tpu.memory_space<vmem>>, vector<8x384xf32>
    %c0_1 = arith.constant 0 : index
    %c0_2 = arith.constant 0 : index
    %1 = vector.load %arg3[%c0_1, %c0_2] : memref<8x128xf32, #tpu.memory_space<vmem>>, vector<8x128xf32>
    %c0_3 = arith.constant 0 : index
    %c0_4 = arith.constant 0 : index
    %2 = vector.load %arg4[%c0_3, %c0_4] : memref<8x1xf32, #tpu.memory_space<vmem>>, vector<8x1xf32>
    %c0_5 = arith.constant 0 : index
    %c0_6 = arith.constant 0 : index
    %c0_7 = arith.constant 0 : index
    %3 = vector.load %arg1[%c0_5, %c0_6, %c0_7] : memref<2x8x16xf32, #tpu.memory_space<vmem>>, vector<1x8x16xf32>
    %4 = vector.shape_cast %3 : vector<1x8x16xf32> to vector<8x16xf32>
    %cst = arith.constant dense<0.000000e+00> : vector<16x384xf32>
    %5 = tpu.matmul %4, %0, %cst {dimension_numbers = #tpu.dot_dimension_numbers<[0], [0], [1], [1], [0, 1, 1, 1], [], []>} : vector<8x16xf32>, vector<8x384xf32>, vector<16x384xf32> -> vector<16x384xf32>
    %6 = vector.extract_strided_slice %5 {offsets = [0, 0], sizes = [16, 128], strides = [1, 1]} : vector<16x384xf32> to vector<16x128xf32>
    %7 = vector.extract_strided_slice %5 {offsets = [0, 128], sizes = [16, 128], strides = [1, 1]} : vector<16x384xf32> to vector<16x128xf32>
    %8 = vector.extract_strided_slice %5 {offsets = [0, 256], sizes = [16, 128], strides = [1, 1]} : vector<16x384xf32> to vector<16x128xf32>
    %9 = vector.extract_strided_slice %6 {offsets = [0, 0], sizes = [16, 32], strides = [1, 1]} : vector<16x128xf32> to vector<16x32xf32>
    %10 = vector.extract_strided_slice %7 {offsets = [0, 0], sizes = [16, 32], strides = [1, 1]} : vector<16x128xf32> to vector<16x32xf32>
    %11 = vector.extract_strided_slice %8 {offsets = [0, 0], sizes = [16, 32], strides = [1, 1]} : vector<16x128xf32> to vector<16x32xf32>
    %cst_8 = arith.constant dense<0.000000e+00> : vector<16x16xf32>
    %12 = tpu.matmul %9, %10, %cst_8 {dimension_numbers = #tpu.dot_dimension_numbers<[1], [1], [0], [0], [0, 0, 1, 0], [], []>} : vector<16x32xf32>, vector<16x32xf32>, vector<16x16xf32> -> vector<16x16xf32>
    %cst_9 = arith.constant 0.176776692 : f32
    %13 = vector.broadcast %cst_9 : f32 to vector<16x16xf32>
    %14 = arith.mulf %12, %13 : vector<16x16xf32>
    %cst_10 = arith.constant dense<0xFF800000> : vector<16xf32>
    %15 = vector.multi_reduction <maximumf>, %14, %cst_10 [1] : vector<16x16xf32> to vector<16xf32>
    %16 = vector.shape_cast %15 : vector<16xf32> to vector<16x1xf32>
    %17 = vector.broadcast %16 : vector<16x1xf32> to vector<16x16xf32>
    %18 = arith.subf %14, %17 : vector<16x16xf32>
    %19 = math.exp %18 : vector<16x16xf32>
    %cst_11 = arith.constant dense<0.000000e+00> : vector<16xf32>
    %20 = vector.multi_reduction <add>, %19, %cst_11 [1] : vector<16x16xf32> to vector<16xf32>
    %21 = vector.shape_cast %20 : vector<16xf32> to vector<16x1xf32>
    %22 = vector.broadcast %21 : vector<16x1xf32> to vector<16x16xf32>
    %23 = arith.divf %19, %22 : vector<16x16xf32>
    %cst_12 = arith.constant dense<0.000000e+00> : vector<16x32xf32>
    %24 = tpu.matmul %23, %11, %cst_12 {dimension_numbers = #tpu.dot_dimension_numbers<[1], [0], [0], [1], [0, 0, 1, 1], [], []>} : vector<16x16xf32>, vector<16x32xf32>, vector<16x32xf32> -> vector<16x32xf32>
    %c0_13 = arith.constant 0 : index
    %c0_14 = arith.constant 0 : index
    %25 = vector.load %arg6[%c0_13, %c0_14] : memref<32x128xf32, #tpu.memory_space<vmem>>, vector<16x32xf32>
    tpu.vector_store %arg6[%c0_13, %c0_14], %24 {strides = array<i32>} : memref<32x128xf32, #tpu.memory_space<vmem>>, vector<16x32xf32>,
    %26 = vector.extract_strided_slice %6 {offsets = [0, 32], sizes = [16, 32], strides = [1, 1]} : vector<16x128xf32> to vector<16x32xf32>
    %27 = vector.extract_strided_slice %7 {offsets = [0, 32], sizes = [16, 32], strides = [1, 1]} : vector<16x128xf32> to vector<16x32xf32>
    %28 = vector.extract_strided_slice %8 {offsets = [0, 32], sizes = [16, 32], strides = [1, 1]} : vector<16x128xf32> to vector<16x32xf32>
    %cst_15 = arith.constant dense<0.000000e+00> : vector<16x16xf32>
    %29 = tpu.matmul %26, %27, %cst_15 {dimension_numbers = #tpu.dot_dimension_numbers<[1], [1], [0], [0], [0, 0, 1, 0], [], []>} : vector<16x32xf32>, vector<16x32xf32>, vector<16x16xf32> -> vector<16x16xf32>
    %cst_16 = arith.constant 0.176776692 : f32
    %30 = vector.broadcast %cst_16 : f32 to vector<16x16xf32>
    %31 = arith.mulf %29, %30 : vector<16x16xf32>
    %cst_17 = arith.constant dense<0xFF800000> : vector<16xf32>
    %32 = vector.multi_reduction <maximumf>, %31, %cst_17 [1] : vector<16x16xf32> to vector<16xf32>
    %33 = vector.shape_cast %32 : vector<16xf32> to vector<16x1xf32>
    %34 = vector.broadcast %33 : vector<16x1xf32> to vector<16x16xf32>
    %35 = arith.subf %31, %34 : vector<16x16xf32>
    %36 = math.exp %35 : vector<16x16xf32>
    %cst_18 = arith.constant dense<0.000000e+00> : vector<16xf32>
    %37 = vector.multi_reduction <add>, %36, %cst_18 [1] : vector<16x16xf32> to vector<16xf32>
    %38 = vector.shape_cast %37 : vector<16xf32> to vector<16x1xf32>
    %39 = vector.broadcast %38 : vector<16x1xf32> to vector<16x16xf32>
    %40 = arith.divf %36, %39 : vector<16x16xf32>
    %cst_19 = arith.constant dense<0.000000e+00> : vector<16x32xf32>
    %41 = tpu.matmul %40, %28, %cst_19 {dimension_numbers = #tpu.dot_dimension_numbers<[1], [0], [0], [1], [0, 0, 1, 1], [], []>} : vector<16x16xf32>, vector<16x32xf32>, vector<16x32xf32> -> vector<16x32xf32>
    %c0_20 = arith.constant 0 : index
    %c32 = arith.constant 32 : index
    %42 = vector.load %arg6[%c0_20, %c32] : memref<32x128xf32, #tpu.memory_space<vmem>>, vector<16x32xf32>
    tpu.vector_store %arg6[%c0_20, %c32], %41 {strides = array<i32>} : memref<32x128xf32, #tpu.memory_space<vmem>>, vector<16x32xf32>,
    %43 = vector.extract_strided_slice %6 {offsets = [0, 64], sizes = [16, 32], strides = [1, 1]} : vector<16x128xf32> to vector<16x32xf32>
    %44 = vector.extract_strided_slice %7 {offsets = [0, 64], sizes = [16, 32], strides = [1, 1]} : vector<16x128xf32> to vector<16x32xf32>
    %45 = vector.extract_strided_slice %8 {offsets = [0, 64], sizes = [16, 32], strides = [1, 1]} : vector<16x128xf32> to vector<16x32xf32>
    %cst_21 = arith.constant dense<0.000000e+00> : vector<16x16xf32>
    %46 = tpu.matmul %43, %44, %cst_21 {dimension_numbers = #tpu.dot_dimension_numbers<[1], [1], [0], [0], [0, 0, 1, 0], [], []>} : vector<16x32xf32>, vector<16x32xf32>, vector<16x16xf32> -> vector<16x16xf32>
    %cst_22 = arith.constant 0.176776692 : f32
    %47 = vector.broadcast %cst_22 : f32 to vector<16x16xf32>
    %48 = arith.mulf %46, %47 : vector<16x16xf32>
    %cst_23 = arith.constant dense<0xFF800000> : vector<16xf32>
    %49 = vector.multi_reduction <maximumf>, %48, %cst_23 [1] : vector<16x16xf32> to vector<16xf32>
    %50 = vector.shape_cast %49 : vector<16xf32> to vector<16x1xf32>
    %51 = vector.broadcast %50 : vector<16x1xf32> to vector<16x16xf32>
    %52 = arith.subf %48, %51 : vector<16x16xf32>
    %53 = math.exp %52 : vector<16x16xf32>
    %cst_24 = arith.constant dense<0.000000e+00> : vector<16xf32>
    %54 = vector.multi_reduction <add>, %53, %cst_24 [1] : vector<16x16xf32> to vector<16xf32>
    %55 = vector.shape_cast %54 : vector<16xf32> to vector<16x1xf32>
    %56 = vector.broadcast %55 : vector<16x1xf32> to vector<16x16xf32>
    %57 = arith.divf %53, %56 : vector<16x16xf32>
    %cst_25 = arith.constant dense<0.000000e+00> : vector<16x32xf32>
    %58 = tpu.matmul %57, %45, %cst_25 {dimension_numbers = #tpu.dot_dimension_numbers<[1], [0], [0], [1], [0, 0, 1, 1], [], []>} : vector<16x16xf32>, vector<16x32xf32>, vector<16x32xf32> -> vector<16x32xf32>
    %c0_26 = arith.constant 0 : index
    %c64 = arith.constant 64 : index
    %59 = vector.load %arg6[%c0_26, %c64] : memref<32x128xf32, #tpu.memory_space<vmem>>, vector<16x32xf32>
    tpu.vector_store %arg6[%c0_26, %c64], %58 {strides = array<i32>} : memref<32x128xf32, #tpu.memory_space<vmem>>, vector<16x32xf32>,
    %60 = vector.extract_strided_slice %6 {offsets = [0, 96], sizes = [16, 32], strides = [1, 1]} : vector<16x128xf32> to vector<16x32xf32>
    %61 = vector.extract_strided_slice %7 {offsets = [0, 96], sizes = [16, 32], strides = [1, 1]} : vector<16x128xf32> to vector<16x32xf32>
    %62 = vector.extract_strided_slice %8 {offsets = [0, 96], sizes = [16, 32], strides = [1, 1]} : vector<16x128xf32> to vector<16x32xf32>
    %cst_27 = arith.constant dense<0.000000e+00> : vector<16x16xf32>
    %63 = tpu.matmul %60, %61, %cst_27 {dimension_numbers = #tpu.dot_dimension_numbers<[1], [1], [0], [0], [0, 0, 1, 0], [], []>} : vector<16x32xf32>, vector<16x32xf32>, vector<16x16xf32> -> vector<16x16xf32>
    %cst_28 = arith.constant 0.176776692 : f32
    %64 = vector.broadcast %cst_28 : f32 to vector<16x16xf32>
    %65 = arith.mulf %63, %64 : vector<16x16xf32>
    %cst_29 = arith.constant dense<0xFF800000> : vector<16xf32>
    %66 = vector.multi_reduction <maximumf>, %65, %cst_29 [1] : vector<16x16xf32> to vector<16xf32>
    %67 = vector.shape_cast %66 : vector<16xf32> to vector<16x1xf32>
    %68 = vector.broadcast %67 : vector<16x1xf32> to vector<16x16xf32>
    %69 = arith.subf %65, %68 : vector<16x16xf32>
    %70 = math.exp %69 : vector<16x16xf32>
    %cst_30 = arith.constant dense<0.000000e+00> : vector<16xf32>
    %71 = vector.multi_reduction <add>, %70, %cst_30 [1] : vector<16x16xf32> to vector<16xf32>
    %72 = vector.shape_cast %71 : vector<16xf32> to vector<16x1xf32>
    %73 = vector.broadcast %72 : vector<16x1xf32> to vector<16x16xf32>
    %74 = arith.divf %70, %73 : vector<16x16xf32>
    %cst_31 = arith.constant dense<0.000000e+00> : vector<16x32xf32>
    %75 = tpu.matmul %74, %62, %cst_31 {dimension_numbers = #tpu.dot_dimension_numbers<[1], [0], [0], [1], [0, 0, 1, 1], [], []>} : vector<16x16xf32>, vector<16x32xf32>, vector<16x32xf32> -> vector<16x32xf32>
    %c0_32 = arith.constant 0 : index
    %c96 = arith.constant 96 : index
    %76 = vector.load %arg6[%c0_32, %c96] : memref<32x128xf32, #tpu.memory_space<vmem>>, vector<16x32xf32>
    tpu.vector_store %arg6[%c0_32, %c96], %75 {strides = array<i32>} : memref<32x128xf32, #tpu.memory_space<vmem>>, vector<16x32xf32>,
    %c1 = arith.constant 1 : index
    %c0_33 = arith.constant 0 : index
    %c0_34 = arith.constant 0 : index
    %77 = vector.load %arg1[%c1, %c0_33, %c0_34] : memref<2x8x16xf32, #tpu.memory_space<vmem>>, vector<1x8x16xf32>
    %78 = vector.shape_cast %77 : vector<1x8x16xf32> to vector<8x16xf32>
    %cst_35 = arith.constant dense<0.000000e+00> : vector<16x384xf32>
    %79 = tpu.matmul %78, %0, %cst_35 {dimension_numbers = #tpu.dot_dimension_numbers<[0], [0], [1], [1], [0, 1, 1, 1], [], []>} : vector<8x16xf32>, vector<8x384xf32>, vector<16x384xf32> -> vector<16x384xf32>
    %80 = vector.extract_strided_slice %79 {offsets = [0, 0], sizes = [16, 128], strides = [1, 1]} : vector<16x384xf32> to vector<16x128xf32>
    %81 = vector.extract_strided_slice %79 {offsets = [0, 128], sizes = [16, 128], strides = [1, 1]} : vector<16x384xf32> to vector<16x128xf32>
    %82 = vector.extract_strided_slice %79 {offsets = [0, 256], sizes = [16, 128], strides = [1, 1]} : vector<16x384xf32> to vector<16x128xf32>
    %83 = vector.extract_strided_slice %80 {offsets = [0, 0], sizes = [16, 32], strides = [1, 1]} : vector<16x128xf32> to vector<16x32xf32>
    %84 = vector.extract_strided_slice %81 {offsets = [0, 0], sizes = [16, 32], strides = [1, 1]} : vector<16x128xf32> to vector<16x32xf32>
    %85 = vector.extract_strided_slice %82 {offsets = [0, 0], sizes = [16, 32], strides = [1, 1]} : vector<16x128xf32> to vector<16x32xf32>
    %cst_36 = arith.constant dense<0.000000e+00> : vector<16x16xf32>
    %86 = tpu.matmul %83, %84, %cst_36 {dimension_numbers = #tpu.dot_dimension_numbers<[1], [1], [0], [0], [0, 0, 1, 0], [], []>} : vector<16x32xf32>, vector<16x32xf32>, vector<16x16xf32> -> vector<16x16xf32>
    %cst_37 = arith.constant 0.176776692 : f32
    %87 = vector.broadcast %cst_37 : f32 to vector<16x16xf32>
    %88 = arith.mulf %86, %87 : vector<16x16xf32>
    %cst_38 = arith.constant dense<0xFF800000> : vector<16xf32>
    %89 = vector.multi_reduction <maximumf>, %88, %cst_38 [1] : vector<16x16xf32> to vector<16xf32>
    %90 = vector.shape_cast %89 : vector<16xf32> to vector<16x1xf32>
    %91 = vector.broadcast %90 : vector<16x1xf32> to vector<16x16xf32>
    %92 = arith.subf %88, %91 : vector<16x16xf32>
    %93 = math.exp %92 : vector<16x16xf32>
    %cst_39 = arith.constant dense<0.000000e+00> : vector<16xf32>
    %94 = vector.multi_reduction <add>, %93, %cst_39 [1] : vector<16x16xf32> to vector<16xf32>
    %95 = vector.shape_cast %94 : vector<16xf32> to vector<16x1xf32>
    %96 = vector.broadcast %95 : vector<16x1xf32> to vector<16x16xf32>
    %97 = arith.divf %93, %96 : vector<16x16xf32>
    %cst_40 = arith.constant dense<0.000000e+00> : vector<16x32xf32>
    %98 = tpu.matmul %97, %85, %cst_40 {dimension_numbers = #tpu.dot_dimension_numbers<[1], [0], [0], [1], [0, 0, 1, 1], [], []>} : vector<16x16xf32>, vector<16x32xf32>, vector<16x32xf32> -> vector<16x32xf32>
    %c16 = arith.constant 16 : index
    %c0_41 = arith.constant 0 : index
    %99 = vector.load %arg6[%c16, %c0_41] : memref<32x128xf32, #tpu.memory_space<vmem>>, vector<16x32xf32>
    tpu.vector_store %arg6[%c16, %c0_41], %98 {strides = array<i32>} : memref<32x128xf32, #tpu.memory_space<vmem>>, vector<16x32xf32>,
    %100 = vector.extract_strided_slice %80 {offsets = [0, 32], sizes = [16, 32], strides = [1, 1]} : vector<16x128xf32> to vector<16x32xf32>
    %101 = vector.extract_strided_slice %81 {offsets = [0, 32], sizes = [16, 32], strides = [1, 1]} : vector<16x128xf32> to vector<16x32xf32>
    %102 = vector.extract_strided_slice %82 {offsets = [0, 32], sizes = [16, 32], strides = [1, 1]} : vector<16x128xf32> to vector<16x32xf32>
    %cst_42 = arith.constant dense<0.000000e+00> : vector<16x16xf32>
    %103 = tpu.matmul %100, %101, %cst_42 {dimension_numbers = #tpu.dot_dimension_numbers<[1], [1], [0], [0], [0, 0, 1, 0], [], []>} : vector<16x32xf32>, vector<16x32xf32>, vector<16x16xf32> -> vector<16x16xf32>
    %cst_43 = arith.constant 0.176776692 : f32
    %104 = vector.broadcast %cst_43 : f32 to vector<16x16xf32>
    %105 = arith.mulf %103, %104 : vector<16x16xf32>
    %cst_44 = arith.constant dense<0xFF800000> : vector<16xf32>
    %106 = vector.multi_reduction <maximumf>, %105, %cst_44 [1] : vector<16x16xf32> to vector<16xf32>
    %107 = vector.shape_cast %106 : vector<16xf32> to vector<16x1xf32>
    %108 = vector.broadcast %107 : vector<16x1xf32> to vector<16x16xf32>
    %109 = arith.subf %105, %108 : vector<16x16xf32>
    %110 = math.exp %109 : vector<16x16xf32>
    %cst_45 = arith.constant dense<0.000000e+00> : vector<16xf32>
    %111 = vector.multi_reduction <add>, %110, %cst_45 [1] : vector<16x16xf32> to vector<16xf32>
    %112 = vector.shape_cast %111 : vector<16xf32> to vector<16x1xf32>
    %113 = vector.broadcast %112 : vector<16x1xf32> to vector<16x16xf32>
    %114 = arith.divf %110, %113 : vector<16x16xf32>
    %cst_46 = arith.constant dense<0.000000e+00> : vector<16x32xf32>
    %115 = tpu.matmul %114, %102, %cst_46 {dimension_numbers = #tpu.dot_dimension_numbers<[1], [0], [0], [1], [0, 0, 1, 1], [], []>} : vector<16x16xf32>, vector<16x32xf32>, vector<16x32xf32> -> vector<16x32xf32>
    %c16_47 = arith.constant 16 : index
    %c32_48 = arith.constant 32 : index
    %116 = vector.load %arg6[%c16_47, %c32_48] : memref<32x128xf32, #tpu.memory_space<vmem>>, vector<16x32xf32>
    tpu.vector_store %arg6[%c16_47, %c32_48], %115 {strides = array<i32>} : memref<32x128xf32, #tpu.memory_space<vmem>>, vector<16x32xf32>,
    %117 = vector.extract_strided_slice %80 {offsets = [0, 64], sizes = [16, 32], strides = [1, 1]} : vector<16x128xf32> to vector<16x32xf32>
    %118 = vector.extract_strided_slice %81 {offsets = [0, 64], sizes = [16, 32], strides = [1, 1]} : vector<16x128xf32> to vector<16x32xf32>
    %119 = vector.extract_strided_slice %82 {offsets = [0, 64], sizes = [16, 32], strides = [1, 1]} : vector<16x128xf32> to vector<16x32xf32>
    %cst_49 = arith.constant dense<0.000000e+00> : vector<16x16xf32>
    %120 = tpu.matmul %117, %118, %cst_49 {dimension_numbers = #tpu.dot_dimension_numbers<[1], [1], [0], [0], [0, 0, 1, 0], [], []>} : vector<16x32xf32>, vector<16x32xf32>, vector<16x16xf32> -> vector<16x16xf32>
    %cst_50 = arith.constant 0.176776692 : f32
    %121 = vector.broadcast %cst_50 : f32 to vector<16x16xf32>
    %122 = arith.mulf %120, %121 : vector<16x16xf32>
    %cst_51 = arith.constant dense<0xFF800000> : vector<16xf32>
    %123 = vector.multi_reduction <maximumf>, %122, %cst_51 [1] : vector<16x16xf32> to vector<16xf32>
    %124 = vector.shape_cast %123 : vector<16xf32> to vector<16x1xf32>
    %125 = vector.broadcast %124 : vector<16x1xf32> to vector<16x16xf32>
    %126 = arith.subf %122, %125 : vector<16x16xf32>
    %127 = math.exp %126 : vector<16x16xf32>
    %cst_52 = arith.constant dense<0.000000e+00> : vector<16xf32>
    %128 = vector.multi_reduction <add>, %127, %cst_52 [1] : vector<16x16xf32> to vector<16xf32>
    %129 = vector.shape_cast %128 : vector<16xf32> to vector<16x1xf32>
    %130 = vector.broadcast %129 : vector<16x1xf32> to vector<16x16xf32>
    %131 = arith.divf %127, %130 : vector<16x16xf32>
    %cst_53 = arith.constant dense<0.000000e+00> : vector<16x32xf32>
    %132 = tpu.matmul %131, %119, %cst_53 {dimension_numbers = #tpu.dot_dimension_numbers<[1], [0], [0], [1], [0, 0, 1, 1], [], []>} : vector<16x16xf32>, vector<16x32xf32>, vector<16x32xf32> -> vector<16x32xf32>
    %c16_54 = arith.constant 16 : index
    %c64_55 = arith.constant 64 : index
    %133 = vector.load %arg6[%c16_54, %c64_55] : memref<32x128xf32, #tpu.memory_space<vmem>>, vector<16x32xf32>
    tpu.vector_store %arg6[%c16_54, %c64_55], %132 {strides = array<i32>} : memref<32x128xf32, #tpu.memory_space<vmem>>, vector<16x32xf32>,
    %134 = vector.extract_strided_slice %80 {offsets = [0, 96], sizes = [16, 32], strides = [1, 1]} : vector<16x128xf32> to vector<16x32xf32>
    %135 = vector.extract_strided_slice %81 {offsets = [0, 96], sizes = [16, 32], strides = [1, 1]} : vector<16x128xf32> to vector<16x32xf32>
    %136 = vector.extract_strided_slice %82 {offsets = [0, 96], sizes = [16, 32], strides = [1, 1]} : vector<16x128xf32> to vector<16x32xf32>
    %cst_56 = arith.constant dense<0.000000e+00> : vector<16x16xf32>
    %137 = tpu.matmul %134, %135, %cst_56 {dimension_numbers = #tpu.dot_dimension_numbers<[1], [1], [0], [0], [0, 0, 1, 0], [], []>} : vector<16x32xf32>, vector<16x32xf32>, vector<16x16xf32> -> vector<16x16xf32>
    %cst_57 = arith.constant 0.176776692 : f32
    %138 = vector.broadcast %cst_57 : f32 to vector<16x16xf32>
    %139 = arith.mulf %137, %138 : vector<16x16xf32>
    %cst_58 = arith.constant dense<0xFF800000> : vector<16xf32>
    %140 = vector.multi_reduction <maximumf>, %139, %cst_58 [1] : vector<16x16xf32> to vector<16xf32>
    %141 = vector.shape_cast %140 : vector<16xf32> to vector<16x1xf32>
    %142 = vector.broadcast %141 : vector<16x1xf32> to vector<16x16xf32>
    %143 = arith.subf %139, %142 : vector<16x16xf32>
    %144 = math.exp %143 : vector<16x16xf32>
    %cst_59 = arith.constant dense<0.000000e+00> : vector<16xf32>
    %145 = vector.multi_reduction <add>, %144, %cst_59 [1] : vector<16x16xf32> to vector<16xf32>
    %146 = vector.shape_cast %145 : vector<16xf32> to vector<16x1xf32>
    %147 = vector.broadcast %146 : vector<16x1xf32> to vector<16x16xf32>
    %148 = arith.divf %144, %147 : vector<16x16xf32>
    %cst_60 = arith.constant dense<0.000000e+00> : vector<16x32xf32>
    %149 = tpu.matmul %148, %136, %cst_60 {dimension_numbers = #tpu.dot_dimension_numbers<[1], [0], [0], [1], [0, 0, 1, 1], [], []>} : vector<16x16xf32>, vector<16x32xf32>, vector<16x32xf32> -> vector<16x32xf32>
    %c16_61 = arith.constant 16 : index
    %c96_62 = arith.constant 96 : index
    %150 = vector.load %arg6[%c16_61, %c96_62] : memref<32x128xf32, #tpu.memory_space<vmem>>, vector<16x32xf32>
    tpu.vector_store %arg6[%c16_61, %c96_62], %149 {strides = array<i32>} : memref<32x128xf32, #tpu.memory_space<vmem>>, vector<16x32xf32>,
    %c0_63 = arith.constant 0 : index
    %c0_64 = arith.constant 0 : index
    %151 = vector.load %arg6[%c0_63, %c0_64] : memref<32x128xf32, #tpu.memory_space<vmem>>, vector<32x128xf32>
    %cst_65 = arith.constant dense<0.000000e+00> : vector<8x32xf32>
    %152 = tpu.matmul %1, %151, %cst_65 {dimension_numbers = #tpu.dot_dimension_numbers<[1], [1], [0], [0], [0, 0, 1, 0], [], []>} : vector<8x128xf32>, vector<32x128xf32>, vector<8x32xf32> -> vector<8x32xf32>
    %153 = vector.broadcast %2 : vector<8x1xf32> to vector<8x32xf32>
    %154 = arith.addf %152, %153 : vector<8x32xf32>
    %155 = vector.extract_strided_slice %154 {offsets = [0, 0], sizes = [8, 16], strides = [1, 1]} : vector<8x32xf32> to vector<8x16xf32>
    %c0_66 = arith.constant 0 : index
    %c0_67 = arith.constant 0 : index
    %c0_68 = arith.constant 0 : index
    %156 = vector.load %arg5[%c0_66, %c0_67, %c0_68] : memref<2x8x16xf32, #tpu.memory_space<vmem>>, vector<1x8x16xf32>
    %157 = vector.shape_cast %156 : vector<1x8x16xf32> to vector<8x16xf32>
    %158 = vector.shape_cast %155 : vector<8x16xf32> to vector<1x8x16xf32>
    tpu.vector_store %arg5[%c0_66, %c0_67, %c0_68], %158 {strides = array<i32>} : memref<2x8x16xf32, #tpu.memory_space<vmem>>, vector<1x8x16xf32>,
    %159 = vector.extract_strided_slice %154 {offsets = [0, 16], sizes = [8, 16], strides = [1, 1]} : vector<8x32xf32> to vector<8x16xf32>
    %c1_69 = arith.constant 1 : index
    %c0_70 = arith.constant 0 : index
    %c0_71 = arith.constant 0 : index
    %160 = vector.load %arg5[%c1_69, %c0_70, %c0_71] : memref<2x8x16xf32, #tpu.memory_space<vmem>>, vector<1x8x16xf32>
    %161 = vector.shape_cast %160 : vector<1x8x16xf32> to vector<8x16xf32>
    %162 = vector.shape_cast %159 : vector<8x16xf32> to vector<1x8x16xf32>
    tpu.vector_store %arg5[%c1_69, %c0_70, %c0_71], %162 {strides = array<i32>} : memref<2x8x16xf32, #tpu.memory_space<vmem>>, vector<1x8x16xf32>,
    return
  }
  func.func @transform_0(%arg0: i32) -> (i32, i32, i32) {
    %c0_i32 = arith.constant 0 : i32
    %c0_i32_0 = arith.constant 0 : i32
    %c0_i32_1 = arith.constant 0 : i32
    %c0_i32_2 = arith.constant 0 : i32
    return %c0_i32, %c0_i32_0, %c0_i32_1 : i32, i32, i32
  }
  func.func @transform_1(%arg0: i32) -> (i32, i32) {
    %c0_i32 = arith.constant 0 : i32
    %c0_i32_0 = arith.constant 0 : i32
    %c0_i32_1 = arith.constant 0 : i32
    return %c0_i32, %c0_i32_0 : i32, i32
  }
  func.func @transform_2(%arg0: i32) -> (i32, i32) {
    %c0_i32 = arith.constant 0 : i32
    %c0_i32_0 = arith.constant 0 : i32
    %c0_i32_1 = arith.constant 0 : i32
    return %c0_i32, %c0_i32_0 : i32, i32
  }
  func.func @transform_3(%arg0: i32) -> (i32, i32) {
    %c0_i32 = arith.constant 0 : i32
    %c0_i32_0 = arith.constant 0 : i32
    %c0_i32_1 = arith.constant 0 : i32
    return %c0_i32, %c0_i32_0 : i32, i32
  }
  func.func @transform_4(%arg0: i32) -> (i32, i32, i32) {
    %c0_i32 = arith.constant 0 : i32
    %c0_i32_0 = arith.constant 0 : i32
    %c0_i32_1 = arith.constant 0 : i32
    %c0_i32_2 = arith.constant 0 : i32
    return %c0_i32, %c0_i32_0, %c0_i32_1 : i32, i32, i32
  }
}

</mosaic_0001>

<bundles_post_ra>
// kernel: tpu_custom_call.1
= control target key start
LH: loop header
LB: loop body
LE: loop exit
PB: predicated region body
PF: predicated region fallthrough
CT: control target
= control target key end

     0   :  { %9 = vsyncpa [#allocation4], 0  ;;  %s3103_s0 = inlined_call_operand.hbm [shape: f32[2,8,16], index: 0, kind: input, shape index: {}]   ;;  %s3104_s1 = inlined_call_operand.hbm [shape: f32[8,384], index: 1, kind: input, shape index: {}]   ;;  %s3105_s2 = inlined_call_operand.vmem [shape: f32[8,128], index: 2, kind: input, shape index: {}]   ;;  %s3106_s3 = inlined_call_operand.vmem [shape: f32[8,1], index: 3, kind: input, shape index: {}]   ;;  %s3107_s4 = inlined_call_operand.hbm [shape: f32[2,8,16], index: 4, kind: output, shape index: {}]  }
   0x1   :  { %10 = vsyncpa [#allocation7], 0 }
   0x2   :  { %11 = vsyncpa [#allocation5], 0  ;;  %s2766_s15 = smov [#allocation3]   ;;  %s2694_s19 = scalar_lea.hbm %s3103_s0, 256 }
   0x3   :  { %s17_s16 = sshll.u32 %s2766_s15, 4  ;;  %p2695_p0 = scmp.ne.s32.totalorder %s3103_s0, %s2694_s19  ;;  %s18_s16 = int_to_ptr.vmem [resolvable:$true] %s17_s16 }
   0x4   :  { %p2698_p1 = scmp.lt.u32.totalorder %s2694_s19, %s3103_s0 }
   0x6   :  { %p2700_p2 = pnand %p2698_p1, %p2695_p0 }
   0x8   :  { %2703 = shalt.err (!%p2700_p2)
}
   0x9   :  { %s2704_s24 = scalar_lea.vmem %s18_s16, 256  ;;  %p2709_p4 = scmp.lt.s32.totalorder %s18_s16, %s18_s16 }
   0xa   :  { %p2705_p3 = scmp.ne.s32.totalorder %s18_s16, %s2704_s24  ;;  %p2710_p5 = scmp.lt.s32.totalorder %s2704_s24, %s2704_s24 }
   0xc   :  { %p2711_p6 = por %p2710_p5, %p2709_p4 }
   0xe   :  { %p2712_p7 = pnand %p2711_p6, %p2705_p3 }
  0x10   :  { %2715 = shalt.err (!%p2712_p7)
}
  0x11   :  { %s2767_s25 = smov 128   ;;  %s2768_s26 = smov 8  }
  0x12   :  { %23 = dma.hbm_to_vmem [thread:$0]  %s3103_s0, 256, %s18_s16, [#allocation4], %s2767_s25, %s2767_s25, %s2768_s26  }
  0x13   :  { %s2769_s29 = smov [#allocation6]   ;;  %s2716_s7 = scalar_lea.hbm %s3104_s1, 384 }
  0x14   :  { %s30_s30 = sshll.u32 %s2769_s29, 4  ;;  %p2717_p8 = scmp.ne.s32.totalorder %s3104_s1, %s2716_s7  ;;  %s31_s30 = int_to_ptr.vmem [resolvable:$true] %s30_s30 }
  0x15   :  { %p2720_p9 = scmp.lt.u32.totalorder %s2716_s7, %s3104_s1 }
  0x17   :  { %p2722_p10 = pnand %p2720_p9, %p2717_p8 }
  0x19   :  { %2725 = shalt.err (!%p2722_p10)
}
  0x1a   :  { %s2726_s12 = scalar_lea.vmem %s31_s30, 384  ;;  %p2731_p12 = scmp.lt.s32.totalorder %s31_s30, %s31_s30 }
  0x1b   :  { %p2727_p11 = scmp.ne.s32.totalorder %s31_s30, %s2726_s12  ;;  %p2732_p13 = scmp.lt.s32.totalorder %s2726_s12, %s2726_s12 }
  0x1d   :  { %p2733_p0 = por %p2732_p13, %p2731_p12 }
  0x1f   :  { %p2734_p1 = pnand %p2733_p0, %p2727_p11 }
  0x21   :  { %2737 = shalt.err (!%p2734_p1)
}
  0x22   :  { %33 = dma.hbm_to_vmem [thread:$0]  %s3104_s1, 384, %s31_s30, [#allocation7]  }
  0x23   :  { %2760 = dma.done.wait [#allocation4], 256  }
  0x24   :  { %2761 = vsyncadd [#allocation4], 4294967040 }
  0x25   :  { %2762 = dma.done.wait [#allocation7], 384  }
  0x26   :  { %2763 = vsyncadd [#allocation7], 4294966912  ;;  %v2770_v0 = vmov 0.0   ;;  %v49_v1 = vld [vmem:[#allocation3] sm:$0xff]  ;;  %v2832_v2 = vld [vmem:[#allocation6 + $0x8] sm:$0xff]  ;;  %vm82_vm0 = vcmask 64512  }
  0x27   :  { %153 = vmatprep.mubr.f32.mxu0 %v2770_v0  ;;  %v2834_v3 = vld [vmem:[#allocation6] sm:$0xff]  ;;  %50 = vxpose.xlu0.b32.start.end [1/1] (short) (narrow) %v49_v1, 16  ;;  %v2838_v4 = vld [vmem:[#allocation6 + $0x10] sm:$0xff]  ;;  %vm241_vm1 = vcmask 261120   ;;  %vm331_vm3 = vcmask 130048   ;;  %s2771_s1 = smov 96  }
  0x28   :  { %89 = vmatprep.subr.mxu0 %v2832_v2  ;;  %2337 = vmatprep.subr.mxu1 %v2838_v4  ;;  %vm2855_vm2 = vmpackc.low %vm241_vm1, %vm241_vm1  ;;  %s2772_s14 = smov 64   ;;  %s2773_s15 = smov 32   ;;  %vm649_vm4 = vcmask 523520   ;;  %vm862_vm5 = vcmask 785920   ;;  %vm1075_vm6 = vcmask 1048320   ;;  %vm2775_vm7 = vmmov 0  }
  0x29   :  { %90 = vmatpush1.msra.mxu0 %v2834_v3  ;;  %2338 = vmatpush3.msra.mxu1 %v2838_v4  ;;  %s2778_s20 = smov [#allocation8]  }
  0x2a   :  { %s2193_s21 = sshll.u32 %s2778_s20, 4  ;;  %s2194_s21 = int_to_ptr.vmem [resolvable:$true] %s2193_s21 }
  0x2b   :  { %s2738_s22 = scalar_lea.vmem %s2194_s21, 256  ;;  %p2743_p3 = scmp.lt.s32.totalorder %s2194_s21, %s2194_s21 }
  0x2c   :  { %p2739_p2 = scmp.ne.s32.totalorder %s2194_s21, %s2738_s22  ;;  %p2744_p4 = scmp.lt.s32.totalorder %s2738_s22, %s2738_s22 }
  0x2e   :  { %p2745_p5 = por %p2744_p4, %p2743_p3 }
  0x30   :  { %p2746_p6 = pnand %p2745_p5, %p2739_p2 }
  0xa7   :  { %v66_v5 = vpop.trf.xlu0 }
  0xa8   :  { %2206 = vmatmul.mubr.msk.f32.vlgmr.msra.gmra.mrb[0].mxu0 %vm82_vm0, %v66_v5  ;;  %2339 = vmatprep.mubr.msk.f32.mxu1 %vm82_vm0, %v66_v5 }
  0xa9   :  { %159 = vmatprep.mubr.f32.mxu0 %v2770_v0 }
  0xab   :  { %v67_v6 = vpop.trf.xlu0 }
  0xac   :  { %2207 = vmatmul.mubr.msk.f32.gmra.mrb[2].mxu0 %vm82_vm0, %v67_v6  ;;  %2340 = vmatmul.mubr.msk.f32.vlgmr.msra.gmra.mrb[0].mxu1 %vm82_vm0, %v67_v6 }
 0x17b   :  { %v2847_v7 = vpop.f32.mrb[0].mxu0 }
 0x17c   :  { %v157_v8 = vpop.f32.mrb[1].mxu0  ;;  %2346 = vmatprep.mubr.msk.f32.mxu0 %vm241_vm1, %v2847_v7 }
 0x17f   :  { %v2851_v9 = vpop.f32.mrb[2].mxu0  ;;  %v2341_v10 = vpop.f32.mrb[0].mxu1 }
 0x180   :  { %v163_v11 = vpop.f32.mrb[3].mxu0  ;;  %v232_v12 = vpop.f32.mrb[1].mxu1 }
 0x181   :  { %v2470_v14 = vpack.c.bf16 %v163_v11, %v157_v8  ;;  %v2476_v15 = vpack.c.bf16 %v2341_v10, %v232_v12  ;;  %v2859_v16 = vpack.i.bf16 %v163_v11, %v157_v8  ;;  %v2861_v17 = vpack.i.bf16 %v2341_v10, %v232_v12 }
 0x183   :  { %2472 = vmatprep.subr.msk.bf16.mxu0 %vm2855_vm2, %v2470_v14  ;;  %2477 = vmatprep.subr.bf16.mxu1 %v2476_v15 }
 0x184   :  { %2475 = vmatpush3.bf16.xpose.msk.msra.mxu0 %vm2855_vm2, %v2470_v14  ;;  %2479 = vmatpush3.bf16.msra.mxu1 %v2476_v15 }
 0x18b   :  { %2347 = vmatmul.mubr.msk.f32.vlgmr.msra.gmra.mrb[4].mxu0 %vm241_vm1, %v2851_v9 }
 0x25e   :  { %v2348_v18 = vpop.f32.mrb[4].mxu0 }
 0x25f   :  { %v330_v19 = vmul.f32 0.17677669, %v2348_v18  ;;  %v320_v20 = vpop.f32.mrb[5].mxu0 }
 0x260   :  { %v329_v21 = vmul.f32 0.17677669, %v320_v20 }
 0x261   :  { %v335_v22 = vsel %vm331_vm3, %v330_v19, -inf }
 0x262   :  { %336 = vmax.xlane.f32.xlu1 %v335_v22  ;;  %v332_v23 = vsel %vm331_vm3, %v329_v21, -inf }
 0x263   :  { %333 = vmax.xlane.f32.xlu0 %v332_v23 }
 0x273   :  { %2570 = vrot.lane.b32.xlu1 %v2859_v16, %s2771_s1 }
 0x277   :  { %2575 = vrot.lane.b32.xlu1 %v2859_v16, %s2772_s14 }
 0x27b   :  { %437 = vrot.lane.b32.xlu1 %v2847_v7, %s2771_s1 }
 0x2ef   :  { %v337_v24 = vpop.xlane.xlu1 %336 }
 0x2f0   :  { %v339_v25 = vsub.f32 %v330_v19, %v337_v24  ;;  %v334_v26 = vpop.xlane.xlu0 %333 }
 0x2f1   :  { %v338_v27 = vsub.f32 %v329_v21, %v334_v26 }
 0x2f2   :  { %v342_v28 = vmul.f32 1.442695, %v339_v25 }
 0x2f3   :  { %v340_v29 = vmul.f32 1.442695, %v338_v27  ;;  %v2571_v30 = vpop.permute.xlu1 %2570 }
 0x2f4   :  { %2630 = vpow2.f32 %v342_v28  ;;  %v2573_v31 = vunpack.i.h.bf16 %v2571_v30  ;;  %v2572_v32 = vunpack.i.l.bf16 %v2571_v30 }
 0x2f5   :  { %2632 = vpow2.f32 %v340_v29 }
 0x2f6   :  { %v2480_v33 = vpack.c.bf16 %v2573_v31, %v2572_v32 }
 0x2f7   :  { %v2576_v38 = vpop.permute.xlu1 %2575 }
 0x2f8   :  { %2482 = vmatprep.subr.msk.bf16.mxu1 %vm2855_vm2, %v2480_v33  ;;  %v2578_v44 = vunpack.i.h.bf16 %v2576_v38  ;;  %v2577_v45 = vunpack.i.l.bf16 %v2576_v38 }
 0x2fa   :  { %v2490_v48 = vpack.c.bf16 %v2578_v44, %v2577_v45 }
 0x2fb   :  { %v438_v39 = vpop.permute.xlu1 %437 }
 0x2fe   :  { %v2631_v34 = vpop.eup %2630 }
 0x2ff   :  { %v347_v35 = vsel %vm331_vm3, %v2631_v34, 0.0  ;;  %v2633_v36 = vpop.eup %2632 }
 0x300   :  { %348 = vadd.xlane.f32.xlu1 %v347_v35  ;;  %v344_v37 = vsel %vm331_vm3, %v2633_v36, 0.0 }
 0x304   :  { %345 = vadd.xlane.f32.xlu1 %v344_v37 }
 0x315   :  { %439 = vrot.lane.b32.xlu1 %v2851_v9, %s2771_s1 }
 0x319   :  { %652 = vrot.lane.b32.xlu1 %v2847_v7, %s2772_s14 }
 0x31d   :  { %654 = vrot.lane.b32.xlu1 %v2851_v9, %s2772_s14 }
 0x38d   :  { %v349_v40 = vpop.xlane.xlu1 %348 }
 0x38e   :  { %2634 = vrcp.f32 %v349_v40 }
 0x391   :  { %v346_v41 = vpop.xlane.xlu1 %345 }
 0x392   :  { %2636 = vrcp.f32 %v346_v41 }
 0x395   :  { %v440_v49 = vpop.permute.xlu1 %439 }
 0x398   :  { %v2635_v42 = vpop.eup %2634 }
 0x399   :  { %v353_v47 = vmul.f32 %v2635_v42, %v2631_v34  ;;  %v653_v50 = vpop.permute.xlu1 %652 }
 0x39c   :  { %v2637_v43 = vpop.eup %2636 }
 0x39d   :  { %v351_v46 = vmul.f32 %v2637_v43, %v2633_v36  ;;  %v655_v51 = vpop.permute.xlu1 %654 }
 0x39f   :  { %2353 = vmatprep.mubr.msk.f32.mxu1 %vm331_vm3, %v351_v46 }
 0x3a0   :  { %2354 = vmatmul.mubr.msk.f32.vlgmr.msra.gmra.mrb[2].mxu1 %vm331_vm3, %v353_v47 }
 0x3a1   :  { %2485 = vmatpush3.bf16.xpose.msk.msra.mxu1 %vm2855_vm2, %v2480_v33  ;;  %2360 = vmatprep.mubr.msk.f32.mxu1 %vm241_vm1, %v438_v39 }
 0x3a2   :  { %2492 = vmatprep.subr.msk.bf16.mxu1 %vm2855_vm2, %v2490_v48 }
 0x3a8   :  { %2361 = vmatmul.mubr.msk.f32.vlgmr.msra.gmra.mrb[4].mxu1 %vm241_vm1, %v440_v49 }
 0x3a9   :  { %2495 = vmatpush3.bf16.xpose.msk.msra.mxu1 %vm2855_vm2, %v2490_v48  ;;  %2374 = vmatprep.mubr.msk.f32.mxu1 %vm241_vm1, %v653_v50 }
 0x3b0   :  { %2375 = vmatmul.mubr.msk.f32.vlgmr.msra.gmra.mrb[6].mxu1 %vm241_vm1, %v655_v51 }
 0x473   :  { %v2355_v52 = vpop.f32.mrb[2].mxu1 }
 0x474   :  { %436 = vst.msk [vmem:[#allocation2 + $0x8] sm:$0xff] %vm241_vm1, %v2355_v52  ;;  %v426_v53 = vpop.f32.mrb[3].mxu1 }
 0x475   :  { %435 = vst.msk [vmem:[#allocation2] sm:$0xff] %vm241_vm1, %v426_v53 }
 0x47b   :  { %v2362_v54 = vpop.f32.mrb[4].mxu1 }
 0x47c   :  { %v519_v55 = vpop.f32.mrb[5].mxu1  ;;  %v529_v62 = vmul.f32 0.17677669, %v2362_v54 }
 0x47d   :  { %v528_v26 = vmul.f32 0.17677669, %v519_v55 }
 0x47e   :  { %v533_v63 = vsel %vm331_vm3, %v529_v62, -inf }
 0x47f   :  { %v530_v27 = vsel %vm331_vm3, %v528_v26, -inf }
 0x483   :  { %v2376_v56 = vpop.f32.mrb[6].mxu1 }
 0x484   :  { %v744_v57 = vmul.f32 0.17677669, %v2376_v56  ;;  %v734_v58 = vpop.f32.mrb[7].mxu1 }
 0x485   :  { %v743_v59 = vmul.f32 0.17677669, %v734_v58 }
 0x486   :  { %v748_v60 = vsel %vm331_vm3, %v744_v57, -inf }
 0x487   :  { %749 = vmax.xlane.f32.xlu0 %v748_v60  ;;  %v745_v61 = vsel %vm331_vm3, %v743_v59, -inf }
 0x488   :  { %746 = vmax.xlane.f32.xlu1 %v745_v61 }
 0x499   :  { %2585 = vrot.lane.b32.xlu1 %v2859_v16, %s2773_s15 }
 0x49d   :  { %2580 = vrot.lane.b32.xlu0 %v2861_v17, %s2772_s14 }
 0x4bd   :  { %534 = vmax.xlane.f32.xlu1 %v533_v63 }
 0x514   :  { %v750_v1 = vpop.xlane.xlu0 %749 }
 0x515   :  { %v752_v5 = vsub.f32 %v744_v57, %v750_v1  ;;  %v747_v6 = vpop.xlane.xlu1 %746  ;;  %v1079_v1 = vld [vmem:[#allocation3 + $0x8] sm:$0xff] }
 0x516   :  { %v751_v8 = vsub.f32 %v743_v59, %v747_v6 }
 0x517   :  { %v755_v10 = vmul.f32 1.442695, %v752_v5 }
 0x518   :  { %v753_v11 = vmul.f32 1.442695, %v751_v8  ;;  %v2581_v12 = vpop.permute.xlu0 %2580 }
 0x519   :  { %2638 = vpow2.f32 %v755_v10  ;;  %v2583_v14 = vunpack.i.h.bf16 %v2581_v12  ;;  %v2582_v15 = vunpack.i.l.bf16 %v2581_v12  ;;  %v2586_v18 = vpop.permute.xlu1 %2585 }
 0x51a   :  { %v2588_v19 = vunpack.i.h.bf16 %v2586_v18  ;;  %v2587_v16 = vunpack.i.l.bf16 %v2586_v18  ;;  %2640 = vpow2.f32 %v753_v11 }
 0x51b   :  { %v2496_v20 = vpack.c.bf16 %v2583_v14, %v2582_v15 }
 0x51c   :  { %v2500_v21 = vpack.c.bf16 %v2588_v19, %v2587_v16 }
 0x51d   :  { %2497 = vmatprep.subr.bf16.mxu1 %v2496_v20 }
 0x51e   :  { %2499 = vmatpush3.bf16.msra.mxu1 %v2496_v20 }
 0x51f   :  { %2502 = vmatprep.subr.msk.bf16.mxu1 %vm2855_vm2, %v2500_v21 }
 0x523   :  { %v2639_v22 = vpop.eup %2638 }
 0x524   :  { %v760_v23 = vsel %vm331_vm3, %v2639_v22, 0.0  ;;  %v2641_v24 = vpop.eup %2640 }
 0x525   :  { %761 = vadd.xlane.f32.xlu0 %v760_v23  ;;  %v757_v25 = vsel %vm331_vm3, %v2641_v24, 0.0 }
 0x529   :  { %758 = vadd.xlane.f32.xlu0 %v757_v25 }
 0x53f   :  { %865 = vrot.lane.b32.xlu0 %v2847_v7, %s2773_s15 }
 0x543   :  { %867 = vrot.lane.b32.xlu0 %v2851_v9, %s2773_s15 }
 0x54a   :  { %v535_v36 = vpop.xlane.xlu1 %534 }
 0x54b   :  { %v537_v39 = vsub.f32 %v529_v62, %v535_v36 }
 0x54d   :  { %v540_v41 = vmul.f32 1.442695, %v537_v39 }
 0x562   :  { %531 = vmax.xlane.f32.xlu0 %v530_v27 }
 0x5b2   :  { %v762_v28 = vpop.xlane.xlu0 %761 }
 0x5b3   :  { %2642 = vrcp.f32 %v762_v28 }
 0x5b6   :  { %v759_v29 = vpop.xlane.xlu0 %758 }
 0x5b7   :  { %2644 = vrcp.f32 %v759_v29 }
 0x5ba   :  { %v866_v34 = vpop.permute.xlu0 %865 }
 0x5bd   :  { %v2643_v30 = vpop.eup %2642 }
 0x5be   :  { %v766_v33 = vmul.f32 %v2643_v30, %v2639_v22  ;;  %v868_v7 = vpop.permute.xlu0 %867 }
 0x5c1   :  { %v2645_v31 = vpop.eup %2644 }
 0x5c2   :  { %v764_v32 = vmul.f32 %v2645_v31, %v2641_v24 }
 0x5c4   :  { %2381 = vmatprep.mubr.msk.f32.mxu1 %vm331_vm3, %v764_v32 }
 0x5c5   :  { %2382 = vmatmul.mubr.msk.f32.vlgmr.msra.gmra.mrb[8].mxu1 %vm331_vm3, %v766_v33 }
 0x5c6   :  { %2505 = vmatpush3.bf16.xpose.msk.msra.mxu1 %vm2855_vm2, %v2500_v21  ;;  %2388 = vmatprep.mubr.msk.f32.mxu1 %vm241_vm1, %v866_v34 }
 0x5c7   :  { %2398 = vmatprep.subr.mxu1 %v2838_v4 }
 0x5cd   :  { %2389 = vmatmul.mubr.msk.f32.vlgmr.msra.gmra.mrb[10].mxu1 %vm241_vm1, %v868_v7 }
 0x5ce   :  { %2399 = vmatpush3.msra.mxu1 %v2838_v4 }
 0x5ef   :  { %v532_v9 = vpop.xlane.xlu0 %531 }
 0x5f0   :  { %v536_v35 = vsub.f32 %v528_v26, %v532_v9 }
 0x5f2   :  { %v538_v40 = vmul.f32 1.442695, %v536_v35 }
 0x5f4   :  { %2646 = vpow2.f32 %v538_v40 }
 0x5f5   :  { %2648 = vpow2.f32 %v540_v41 }
 0x5fe   :  { %v2647_v47 = vpop.eup %2646 }
 0x5ff   :  { %v542_v48 = vsel %vm331_vm3, %v2647_v47, 0.0  ;;  %v2649_v49 = vpop.eup %2648 }
 0x600   :  { %v545_v50 = vsel %vm331_vm3, %v2649_v49, 0.0 }
 0x698   :  { %v2925_v37 = vpop.f32.mrb[8].mxu1 }
 0x699   :  { %v2927_v38 = vpop.f32.mrb[9].mxu1 }
 0x6a0   :  { %v2390_v42 = vpop.f32.mrb[10].mxu1 }
 0x6a1   :  { %v947_v43 = vpop.f32.mrb[11].mxu1  ;;  %v957_v45 = vmul.f32 0.17677669, %v2390_v42 }
 0x6a2   :  { %v956_v44 = vmul.f32 0.17677669, %v947_v43 }
 0x6a3   :  { %v961_v4 = vsel %vm331_vm3, %v957_v45, -inf }
 0x6a4   :  { %v958_v46 = vsel %vm331_vm3, %v956_v44, -inf }
 0x6a5   :  { %959 = vmax.xlane.f32.xlu0 %v958_v46 }
 0x6a9   :  { %962 = vmax.xlane.f32.xlu0 %v961_v4 }
 0x6ad   :  { %543 = vadd.xlane.f32.xlu0 %v542_v48 }
 0x6b1   :  { %546 = vadd.xlane.f32.xlu0 %v545_v50 }
 0x732   :  { %v960_v51 = vpop.xlane.xlu0 %959 }
 0x733   :  { %v964_v52 = vsub.f32 %v956_v44, %v960_v51 }
 0x735   :  { %v966_v53 = vmul.f32 1.442695, %v964_v52 }
 0x736   :  { %v963_v54 = vpop.xlane.xlu0 %962 }
 0x737   :  { %2650 = vpow2.f32 %v966_v53  ;;  %v965_v55 = vsub.f32 %v957_v45, %v963_v54 }
 0x739   :  { %v968_v56 = vmul.f32 1.442695, %v965_v55 }
 0x73a   :  { %v544_v57 = vpop.xlane.xlu0 %543 }
 0x73b   :  { %2652 = vpow2.f32 %v968_v56 }
 0x73c   :  { %2654 = vrcp.f32 %v544_v57 }
 0x73e   :  { %v547_v5 = vpop.xlane.xlu0 %546 }
 0x73f   :  { %2656 = vrcp.f32 %v547_v5 }
 0x741   :  { %v2651_v58 = vpop.eup %2650 }
 0x742   :  { %v970_v59 = vsel %vm331_vm3, %v2651_v58, 0.0 }
 0x743   :  { %971 = vadd.xlane.f32.xlu1 %v970_v59 }
 0x745   :  { %v2653_v60 = vpop.eup %2652 }
 0x746   :  { %v2655_v61 = vpop.eup %2654  ;;  %v973_v62 = vsel %vm331_vm3, %v2653_v60, 0.0 }
 0x747   :  { %974 = vadd.xlane.f32.xlu0 %v973_v62  ;;  %v549_v63 = vmul.f32 %v2655_v61, %v2647_v47 }
 0x749   :  { %2367 = vmatprep.mubr.msk.f32.mxu0 %vm331_vm3, %v549_v63  ;;  %v2657_v15 = vpop.eup %2656 }
 0x754   :  { %2590 = vrot.lane.b32.xlu1 %v2861_v17, %s2771_s1 }
 0x75d   :  { %2595 = vrot.lane.b32.xlu0 %v2861_v17, %s2773_s15  ;;  %v551_v17 = vmul.f32 %v2657_v15, %v2649_v49 }
 0x77d   :  { %1080 = vxpose.xlu1.b32.start.end [1/1] (short) (narrow) %v1079_v1, 16 }
 0x7d0   :  { %v972_v6 = vpop.xlane.xlu1 %971 }
 0x7d1   :  { %2658 = vrcp.f32 %v972_v6 }
 0x7d4   :  { %v2591_v8 = vpop.permute.xlu1 %2590  ;;  %v975_v10 = vpop.xlane.xlu0 %974 }
 0x7d5   :  { %v2593_v11 = vunpack.i.h.bf16 %v2591_v8  ;;  %v2592_v12 = vunpack.i.l.bf16 %v2591_v8  ;;  %2660 = vrcp.f32 %v975_v10 }
 0x7d7   :  { %v2486_v14 = vpack.c.bf16 %v2593_v11, %v2592_v12 }
 0x7d8   :  { %v2596_v18 = vpop.permute.xlu0 %2595 }
 0x7d9   :  { %v2598_v19 = vunpack.i.h.bf16 %v2596_v18  ;;  %v2597_v16 = vunpack.i.l.bf16 %v2596_v18  ;;  %2487 = vmatprep.subr.bf16.mxu0 %v2486_v14 }
 0x7da   :  { %2489 = vmatpush3.bf16.msra.mxu0 %v2486_v14 }
 0x7db   :  { %v2659_v20 = vpop.eup %2658  ;;  %v2506_v21 = vpack.c.bf16 %v2598_v19, %v2597_v16 }
 0x7dc   :  { %v977_v22 = vmul.f32 %v2659_v20, %v2651_v58 }
 0x7dd   :  { %2368 = vmatmul.mubr.msk.f32.vlgmr.msra.gmra.mrb[6].mxu0 %vm331_vm3, %v551_v17  ;;  %2507 = vmatprep.subr.bf16.mxu0 %v2506_v21 }
 0x7de   :  { %2509 = vmatpush3.bf16.msra.mxu0 %v2506_v21  ;;  %2395 = vmatprep.mubr.msk.f32.mxu0 %vm331_vm3, %v977_v22 }
 0x7df   :  { %v2661_v23 = vpop.eup %2660  ;;  %1118 = vmatprep.subr.mxu0 %v2832_v2 }
 0x7e0   :  { %v979_v24 = vmul.f32 %v2661_v23, %v2653_v60 }
 0x7e2   :  { %2396 = vmatmul.mubr.msk.f32.vlgmr.msra.gmra.mrb[8].mxu0 %vm331_vm3, %v979_v24 }
 0x7e3   :  { %1119 = vmatpush1.msra.mxu0 %v2834_v3  ;;  %1182 = vmatprep.mubr.f32.mxu0 %v2770_v0 }
 0x7fd   :  { %v1096_v25 = vpop.trf.xlu1 }
 0x7fe   :  { %2234 = vmatmul.mubr.msk.f32.vlgmr.msra.gmra.mrb[10].mxu0 %vm82_vm0, %v1096_v25  ;;  %2400 = vmatprep.mubr.msk.f32.mxu1 %vm82_vm0, %v1096_v25 }
 0x7ff   :  { %1188 = vmatprep.mubr.f32.mxu0 %v2770_v0 }
 0x801   :  { %v1097_v26 = vpop.trf.xlu1 }
 0x802   :  { %2235 = vmatmul.mubr.msk.f32.gmra.mrb[12].mxu0 %vm82_vm0, %v1097_v26  ;;  %2401 = vmatmul.mubr.msk.f32.vlgmr.msra.gmra.mrb[12].mxu1 %vm82_vm0, %v1097_v26 }
 0x8b0   :  { %v2951_v2 = vpop.f32.mrb[6].mxu0 }
 0x8b1   :  { %v2953_v27 = vpop.f32.mrb[7].mxu0 }
 0x8b5   :  { %v2955_v28 = vpop.f32.mrb[8].mxu0 }
 0x8b6   :  { %v2957_v3 = vpop.f32.mrb[9].mxu0 }
 0x8d1   :  { %v2959_v29 = vpop.f32.mrb[10].mxu0 }
 0x8d2   :  { %v1186_v30 = vpop.f32.mrb[11].mxu0  ;;  %2407 = vmatprep.mubr.msk.f32.mxu0 %vm241_vm1, %v2959_v29 }
 0x8d5   :  { %v2963_v31 = vpop.f32.mrb[12].mxu0  ;;  %v2402_v32 = vpop.f32.mrb[12].mxu1 }
 0x8d6   :  { %v1192_v33 = vpop.f32.mrb[13].mxu0  ;;  %v1261_v34 = vpop.f32.mrb[13].mxu1 }
 0x8d7   :  { %v2510_v7 = vpack.c.bf16 %v1192_v33, %v1186_v30  ;;  %v2516_v9 = vpack.c.bf16 %v2402_v32, %v1261_v34  ;;  %v2965_v35 = vpack.i.bf16 %v1192_v33, %v1186_v30  ;;  %v2967_v36 = vpack.i.bf16 %v2402_v32, %v1261_v34 }
 0x8d9   :  { %2512 = vmatprep.subr.msk.bf16.mxu0 %vm2855_vm2, %v2510_v7  ;;  %2517 = vmatprep.subr.bf16.mxu1 %v2516_v9 }
 0x8da   :  { %2515 = vmatpush3.bf16.xpose.msk.msra.mxu0 %vm2855_vm2, %v2510_v7  ;;  %2519 = vmatpush3.bf16.msra.mxu1 %v2516_v9 }
 0x8e1   :  { %2408 = vmatmul.mubr.msk.f32.vlgmr.msra.gmra.mrb[14].mxu0 %vm241_vm1, %v2963_v31 }
 0x9b4   :  { %v2409_v39 = vpop.f32.mrb[14].mxu0 }
 0x9b5   :  { %v1348_v40 = vpop.f32.mrb[15].mxu0  ;;  %v1358_v42 = vmul.f32 0.17677669, %v2409_v39 }
 0x9b6   :  { %v1357_v41 = vmul.f32 0.17677669, %v1348_v40 }
 0x9b7   :  { %v1362_v44 = vsel %vm331_vm3, %v1358_v42, -inf }
 0x9b8   :  { %v1359_v43 = vsel %vm331_vm3, %v1357_v41, -inf }
 0x9b9   :  { %1360 = vmax.xlane.f32.xlu0 %v1359_v43 }
 0x9bd   :  { %1363 = vmax.xlane.f32.xlu0 %v1362_v44 }
 0xa46   :  { %v1361_v45 = vpop.xlane.xlu0 %1360 }
 0xa47   :  { %v1365_v46 = vsub.f32 %v1357_v41, %v1361_v45 }
 0xa49   :  { %v1367_v4 = vmul.f32 1.442695, %v1365_v46 }
 0xa4a   :  { %v1364_v47 = vpop.xlane.xlu0 %1363 }
 0xa4b   :  { %2662 = vpow2.f32 %v1367_v4  ;;  %v1366_v48 = vsub.f32 %v1358_v42, %v1364_v47 }
 0xa4d   :  { %v1369_v49 = vmul.f32 1.442695, %v1366_v48 }
 0xa4f   :  { %2664 = vpow2.f32 %v1369_v49 }
 0xa55   :  { %v2663_v50 = vpop.eup %2662 }
 0xa56   :  { %v1371_v51 = vsel %vm331_vm3, %v2663_v50, 0.0 }
 0xa57   :  { %1372 = vadd.xlane.f32.xlu1 %v1371_v51 }
 0xa59   :  { %v2665_v52 = vpop.eup %2664 }
 0xa5a   :  { %v1374_v53 = vsel %vm331_vm3, %v2665_v52, 0.0 }
 0xa5b   :  { %1375 = vadd.xlane.f32.xlu0 %v1374_v53 }
 0xa71   :  { %2600 = vrot.lane.b32.xlu0 %v2965_v35, %s2771_s1 }
 0xa75   :  { %1464 = vrot.lane.b32.xlu0 %v2959_v29, %s2771_s1 }
 0xa79   :  { %1466 = vrot.lane.b32.xlu0 %v2963_v31, %s2771_s1 }
 0xae4   :  { %v1373_v54 = vpop.xlane.xlu1 %1372 }
 0xae5   :  { %2666 = vrcp.f32 %v1373_v54 }
 0xae8   :  { %v1376_v55 = vpop.xlane.xlu0 %1375 }
 0xae9   :  { %2668 = vrcp.f32 %v1376_v55 }
 0xaec   :  { %v2601_v56 = vpop.permute.xlu0 %2600 }
 0xaed   :  { %v2603_v57 = vunpack.i.h.bf16 %v2601_v56  ;;  %v2602_v58 = vunpack.i.l.bf16 %v2601_v56 }
 0xaef   :  { %v2667_v59 = vpop.eup %2666  ;;  %v2520_v60 = vpack.c.bf16 %v2603_v57, %v2602_v58 }
 0xaf0   :  { %v1378_v61 = vmul.f32 %v2667_v59, %v2663_v50  ;;  %v1465_v1 = vpop.permute.xlu0 %1464 }
 0xaf1   :  { %2522 = vmatprep.subr.msk.bf16.mxu1 %vm2855_vm2, %v2520_v60 }
 0xaf2   :  { %2414 = vmatprep.mubr.msk.f32.mxu1 %vm331_vm3, %v1378_v61 }
 0xaf3   :  { %v2669_v62 = vpop.eup %2668 }
 0xaf4   :  { %v1380_v63 = vmul.f32 %v2669_v62, %v2665_v52  ;;  %v1467_v5 = vpop.permute.xlu0 %1466 }
 0xaf6   :  { %2415 = vmatmul.mubr.msk.f32.vlgmr.msra.gmra.mrb[14].mxu1 %vm331_vm3, %v1380_v63 }
 0xaf7   :  { %2525 = vmatpush3.bf16.xpose.msk.msra.mxu1 %vm2855_vm2, %v2520_v60  ;;  %2421 = vmatprep.mubr.msk.f32.mxu1 %vm241_vm1, %v1465_v1 }
 0xafe   :  { %2422 = vmatmul.mubr.msk.f32.vlgmr.msra.gmra.mrb[16].mxu1 %vm241_vm1, %v1467_v5 }
 0xbc9   :  { %v2416_v6 = vpop.f32.mrb[14].mxu1 }
 0xbca   :  { %1463 = vst.msk [vmem:[#allocation2 + $0x18] sm:$0xff] %vm241_vm1, %v2416_v6  ;;  %v1453_v8 = vpop.f32.mrb[15].mxu1 }
 0xbcb   :  { %1462 = vst.msk [vmem:[#allocation2 + $0x10] sm:$0xff] %vm241_vm1, %v1453_v8 }
 0xbd1   :  { %v2423_v10 = vpop.f32.mrb[16].mxu1 }
 0xbd2   :  { %v1556_v11 = vmul.f32 0.17677669, %v2423_v10  ;;  %v1546_v12 = vpop.f32.mrb[17].mxu1 }
 0xbd3   :  { %v1555_v14 = vmul.f32 0.17677669, %v1546_v12 }
 0xbd4   :  { %v1560_v15 = vsel %vm331_vm3, %v1556_v11, -inf }
 0xbd5   :  { %1561 = vmax.xlane.f32.xlu1 %v1560_v15  ;;  %v1557_v18 = vsel %vm331_vm3, %v1555_v14, -inf }
 0xbd6   :  { %1558 = vmax.xlane.f32.xlu0 %v1557_v18 }
 0xbe6   :  { %2605 = vrot.lane.b32.xlu1 %v2967_v36, %s2771_s1 }
 0xbea   :  { %1678 = vrot.lane.b32.xlu1 %v2959_v29, %s2772_s14 }
 0xbec   :  { %2610 = vrot.lane.b32.xlu0 %v2965_v35, %s2772_s14 }
 0xc62   :  { %v1562_v19 = vpop.xlane.xlu1 %1561 }
 0xc63   :  { %v1564_v16 = vsub.f32 %v1556_v11, %v1562_v19  ;;  %v1559_v20 = vpop.xlane.xlu0 %1558 }
 0xc64   :  { %v1563_v17 = vsub.f32 %v1555_v14, %v1559_v20 }
 0xc65   :  { %v1567_v21 = vmul.f32 1.442695, %v1564_v16 }
 0xc66   :  { %v1565_v22 = vmul.f32 1.442695, %v1563_v17  ;;  %v2606_v23 = vpop.permute.xlu1 %2605 }
 0xc67   :  { %2670 = vpow2.f32 %v1567_v21  ;;  %v2608_v24 = vunpack.i.h.bf16 %v2606_v23  ;;  %v2607_v25 = vunpack.i.l.bf16 %v2606_v23  ;;  %v2611_v26 = vpop.permute.xlu0 %2610 }
 0xc68   :  { %v2613_v30 = vunpack.i.h.bf16 %v2611_v26  ;;  %v2612_v32 = vunpack.i.l.bf16 %v2611_v26  ;;  %2672 = vpow2.f32 %v1565_v22 }
 0xc69   :  { %v2526_v33 = vpack.c.bf16 %v2608_v24, %v2607_v25 }
 0xc6a   :  { %v2530_v34 = vpack.c.bf16 %v2613_v30, %v2612_v32  ;;  %v1679_v41 = vpop.permute.xlu1 %1678 }
 0xc6b   :  { %2527 = vmatprep.subr.bf16.mxu0 %v2526_v33 }
 0xc6c   :  { %2529 = vmatpush3.bf16.msra.mxu0 %v2526_v33 }
 0xc6d   :  { %2532 = vmatprep.subr.msk.bf16.mxu0 %vm2855_vm2, %v2530_v34 }
 0xc71   :  { %v2671_v7 = vpop.eup %2670 }
 0xc72   :  { %v1572_v9 = vsel %vm331_vm3, %v2671_v7, 0.0  ;;  %v2673_v39 = vpop.eup %2672 }
 0xc73   :  { %1573 = vadd.xlane.f32.xlu1 %v1572_v9  ;;  %v1569_v40 = vsel %vm331_vm3, %v2673_v39, 0.0 }
 0xc77   :  { %1570 = vadd.xlane.f32.xlu1 %v1569_v40 }
 0xc88   :  { %1680 = vrot.lane.b32.xlu1 %v2963_v31, %s2772_s14 }
 0xd00   :  { %v1574_v42 = vpop.xlane.xlu1 %1573 }
 0xd01   :  { %2674 = vrcp.f32 %v1574_v42 }
 0xd04   :  { %v1571_v43 = vpop.xlane.xlu1 %1570 }
 0xd05   :  { %2676 = vrcp.f32 %v1571_v43 }
 0xd08   :  { %v1681_v47 = vpop.permute.xlu1 %1680 }
 0xd0b   :  { %v2675_v44 = vpop.eup %2674 }
 0xd0c   :  { %v1578_v4 = vmul.f32 %v2675_v44, %v2671_v7 }
 0xd0f   :  { %v2677_v45 = vpop.eup %2676 }
 0xd10   :  { %v1576_v46 = vmul.f32 %v2677_v45, %v2673_v39 }
 0xd12   :  { %2428 = vmatprep.mubr.msk.f32.mxu0 %vm331_vm3, %v1576_v46 }
 0xd13   :  { %2429 = vmatmul.mubr.msk.f32.vlgmr.msra.gmra.mrb[16].mxu0 %vm331_vm3, %v1578_v4 }
 0xd14   :  { %2535 = vmatpush3.bf16.xpose.msk.msra.mxu0 %vm2855_vm2, %v2530_v34  ;;  %2435 = vmatprep.mubr.msk.f32.mxu0 %vm241_vm1, %v1679_v41 }
 0xd1b   :  { %2436 = vmatmul.mubr.msk.f32.vlgmr.msra.gmra.mrb[18].mxu0 %vm241_vm1, %v1681_v47 }
 0xde6   :  { %v3015_v48 = vpop.f32.mrb[16].mxu0 }
 0xde7   :  { %v3017_v49 = vpop.f32.mrb[17].mxu0 }
 0xdee   :  { %v2437_v50 = vpop.f32.mrb[18].mxu0 }
 0xdef   :  { %v1770_v51 = vmul.f32 0.17677669, %v2437_v50  ;;  %v1760_v52 = vpop.f32.mrb[19].mxu0 }
 0xdf0   :  { %v1769_v53 = vmul.f32 0.17677669, %v1760_v52 }
 0xdf1   :  { %v1774_v54 = vsel %vm331_vm3, %v1770_v51, -inf }
 0xdf2   :  { %1775 = vmax.xlane.f32.xlu0 %v1774_v54  ;;  %v1771_v55 = vsel %vm331_vm3, %v1769_v53, -inf }
 0xdf3   :  { %1772 = vmax.xlane.f32.xlu1 %v1771_v55 }
 0xe04   :  { %2620 = vrot.lane.b32.xlu1 %v2965_v35, %s2773_s15 }
 0xe08   :  { %2615 = vrot.lane.b32.xlu0 %v2967_v36, %s2772_s14 }
 0xe0c   :  { %1892 = vrot.lane.b32.xlu0 %v2963_v31, %s2773_s15 }
 0xe7f   :  { %v1776_v56 = vpop.xlane.xlu0 %1775 }
 0xe80   :  { %v1778_v57 = vsub.f32 %v1770_v51, %v1776_v56  ;;  %v1773_v58 = vpop.xlane.xlu1 %1772 }
 0xe81   :  { %v1777_v59 = vsub.f32 %v1769_v53, %v1773_v58 }
 0xe82   :  { %v1781_v60 = vmul.f32 1.442695, %v1778_v57 }
 0xe83   :  { %v1779_v61 = vmul.f32 1.442695, %v1777_v59  ;;  %v2616_v62 = vpop.permute.xlu0 %2615 }
 0xe84   :  { %2678 = vpow2.f32 %v1781_v60  ;;  %v2618_v63 = vunpack.i.h.bf16 %v2616_v62  ;;  %v2617_v1 = vunpack.i.l.bf16 %v2616_v62  ;;  %v2621_v5 = vpop.permute.xlu1 %2620 }
 0xe85   :  { %v2623_v6 = vunpack.i.h.bf16 %v2621_v5  ;;  %v2622_v8 = vunpack.i.l.bf16 %v2621_v5  ;;  %2680 = vpow2.f32 %v1779_v61 }
 0xe86   :  { %v2536_v35 = vpack.c.bf16 %v2618_v63, %v2617_v1  ;;  %v48_v63 = vld [vmem:[%s3106_s3] sm:$0xff]  ;;  %v2776_v1 = vmov 0   ;;  %s2777_s3 = smov 112  }
 0xe87   :  { %v2540_v10 = vpack.c.bf16 %v2623_v6, %v2622_v8  ;;  %v1893_v22 = vpop.permute.xlu0 %1892  ;;  %2629 = vset.pattern.permute.xlu0 %v2776_v1 }
 0xe88   :  { %2537 = vmatprep.subr.bf16.mxu1 %v2536_v35 }
 0xe89   :  { %2539 = vmatpush3.bf16.msra.mxu1 %v2536_v35 }
 0xe8a   :  { %2542 = vmatprep.subr.msk.bf16.mxu1 %vm2855_vm2, %v2540_v10 }
 0xe8e   :  { %v2679_v31 = vpop.eup %2678 }
 0xe8f   :  { %v1786_v11 = vsel %vm331_vm3, %v2679_v31, 0.0  ;;  %v2681_v12 = vpop.eup %2680 }
 0xe90   :  { %1787 = vadd.xlane.f32.xlu1 %v1786_v11  ;;  %v1783_v14 = vsel %vm331_vm3, %v2681_v12, 0.0 }
 0xe94   :  { %1784 = vadd.xlane.f32.xlu1 %v1783_v14 }
 0xea5   :  { %1890 = vrot.lane.b32.xlu1 %v2959_v29, %s2773_s15 }
 0xf1d   :  { %v1788_v15 = vpop.xlane.xlu1 %1787 }
 0xf1e   :  { %2682 = vrcp.f32 %v1788_v15 }
 0xf21   :  { %v1785_v18 = vpop.xlane.xlu1 %1784 }
 0xf22   :  { %2684 = vrcp.f32 %v1785_v18 }
 0xf25   :  { %v1891_v21 = vpop.permute.xlu1 %1890 }
 0xf28   :  { %v2683_v19 = vpop.eup %2682 }
 0xf29   :  { %v1792_v17 = vmul.f32 %v2683_v19, %v2679_v31 }
 0xf2c   :  { %v2685_v16 = vpop.eup %2684 }
 0xf2d   :  { %v1790_v20 = vmul.f32 %v2685_v16, %v2681_v12 }
 0xf2f   :  { %2442 = vmatprep.mubr.msk.f32.mxu1 %vm331_vm3, %v1790_v20 }
 0xf30   :  { %2443 = vmatmul.mubr.msk.f32.vlgmr.msra.gmra.mrb[18].mxu1 %vm331_vm3, %v1792_v17 }
 0xf31   :  { %2545 = vmatpush3.bf16.xpose.msk.msra.mxu1 %vm2855_vm2, %v2540_v10  ;;  %2449 = vmatprep.mubr.msk.f32.mxu1 %vm241_vm1, %v1891_v21  ;;  %v47_v10 = vld [vmem:[%s3105_s2] sm:$0xff] }
 0xf38   :  { %2450 = vmatmul.mubr.msk.f32.vlgmr.msra.gmra.mrb[20].mxu1 %vm241_vm1, %v1893_v22 }
0x1003   :  { %v2444_v29 = vpop.f32.mrb[18].mxu1 }
0x1004   :  { %v1871_v23 = vpop.f32.mrb[19].mxu1 }
0x100b   :  { %v2451_v24 = vpop.f32.mrb[20].mxu1 }
0x100c   :  { %v1982_v25 = vmul.f32 0.17677669, %v2451_v24  ;;  %v1972_v26 = vpop.f32.mrb[21].mxu1 }
0x100d   :  { %v1981_v30 = vmul.f32 0.17677669, %v1972_v26 }
0x100e   :  { %v1986_v32 = vsel %vm331_vm3, %v1982_v25, -inf }
0x100f   :  { %1987 = vmax.xlane.f32.xlu0 %v1986_v32  ;;  %v1983_v33 = vsel %vm331_vm3, %v1981_v30, -inf }
0x1010   :  { %1984 = vmax.xlane.f32.xlu1 %v1983_v33 }
0x109c   :  { %v1988_v34 = vpop.xlane.xlu0 %1987 }
0x109d   :  { %v1990_v13 = vsub.f32 %v1982_v25, %v1988_v34  ;;  %v1985_v7 = vpop.xlane.xlu1 %1984 }
0x109e   :  { %v1989_v9 = vsub.f32 %v1981_v30, %v1985_v7 }
0x109f   :  { %v1993_v39 = vmul.f32 1.442695, %v1990_v13 }
0x10a0   :  { %v1991_v40 = vmul.f32 1.442695, %v1989_v9 }
0x10a1   :  { %2686 = vpow2.f32 %v1993_v39 }
0x10a2   :  { %2688 = vpow2.f32 %v1991_v40 }
0x10ab   :  { %v2687_v41 = vpop.eup %2686 }
0x10ac   :  { %v2689_v42 = vpop.eup %2688  ;;  %v1998_v43 = vsel %vm331_vm3, %v2687_v41, 0.0 }
0x10ad   :  { %1999 = vadd.xlane.f32.xlu1 %v1998_v43  ;;  %v1995_v44 = vsel %vm331_vm3, %v2689_v42, 0.0 }
0x10ae   :  { %1996 = vadd.xlane.f32.xlu0 %v1995_v44 }
0x10be   :  { %643 = vrot.lane.b32.xlu1 %v2953_v27, %s2773_s15 }
0x10c2   :  { %645 = vrot.lane.b32.xlu1 %v2951_v2, %s2773_s15 }
0x10c4   :  { %2625 = vrot.lane.b32.xlu0 %v2967_v36, %s2773_s15 }
0x10c6   :  { %858 = vrot.lane.b32.xlu1 %v2925_v37, %s2772_s14 }
0x10c8   :  { %856 = vrot.lane.b32.xlu0 %v2927_v38, %s2772_s14 }
0x10ca   :  { %1071 = vrot.lane.b32.xlu1 %v2955_v28, %s2771_s1 }
0x10cc   :  { %1069 = vrot.lane.b32.xlu0 %v2957_v3, %s2771_s1 }
0x10ce   :  { %1672 = vrot.lane.b32.xlu1 %v3015_v48, %s2773_s15 }
0x10d0   :  { %1670 = vrot.lane.b32.xlu0 %v3017_v49, %s2773_s15  ;;  %v2774_v49 = vmov 0.0|0.0  }
0x10d2   :  { %1884 = vrot.lane.b32.xlu1 %v2444_v29, %s2772_s14 }
0x10d4   :  { %1882 = vrot.lane.b32.xlu0 %v1871_v23, %s2772_s14 }
0x113a   :  { %v2000_v37 = vpop.xlane.xlu1 %1999 }
0x113b   :  { %2690 = vrcp.f32 %v2000_v37  ;;  %v1997_v2 = vpop.xlane.xlu0 %1996 }
0x113c   :  { %2692 = vrcp.f32 %v1997_v2 }
0x113e   :  { %v644_v38 = vpop.permute.xlu1 %643 }
0x113f   :  { %650 = vst.msk [vmem:[#allocation2] sm:$0xff] %vm649_vm4, %v644_v38  ;;  %v2626_v27 = vpop.permute.xlu0 %2625 }
0x1140   :  { %v2628_v28 = vunpack.i.h.bf16 %v2626_v27  ;;  %v2627_v3 = vunpack.i.l.bf16 %v2626_v27 }
0x1142   :  { %v2546_v36 = vpack.c.bf16 %v2628_v28, %v2627_v3  ;;  %v646_v45 = vpop.permute.xlu1 %645 }
0x1143   :  { %651 = vst.msk [vmem:[#allocation2 + $0x8] sm:$0xff] %vm649_vm4, %v646_v45  ;;  %v857_v46 = vpop.permute.xlu0 %856 }
0x1144   :  { %863 = vst.msk [vmem:[#allocation2] sm:$0xff] %vm862_vm5, %v857_v46  ;;  %2547 = vmatprep.subr.bf16.mxu0 %v2546_v36 }
0x1145   :  { %v2691_v4 = vpop.eup %2690  ;;  %2549 = vmatpush3.bf16.msra.mxu0 %v2546_v36 }
0x1146   :  { %v2693_v47 = vpop.eup %2692  ;;  %v859_v48 = vpop.permute.xlu1 %858  ;;  %2550 = vmatprep.subr.bf16.mxu0 %v2774_v49  ;;  %v2004_v52 = vmul.f32 %v2691_v4, %v2687_v41 }
0x1147   :  { %864 = vst.msk [vmem:[#allocation2 + $0x8] sm:$0xff] %vm862_vm5, %v859_v48  ;;  %v1070_v50 = vpop.permute.xlu0 %1069  ;;  %v2002_v51 = vmul.f32 %v2693_v47, %v2689_v42 }
0x1148   :  { %1076 = vst.msk [vmem:[#allocation2] sm:$0xff] %vm1075_vm6, %v1070_v50 }
0x1149   :  { %2456 = vmatprep.mubr.msk.f32.mxu0 %vm331_vm3, %v2002_v51 }
0x114a   :  { %2457 = vmatmul.mubr.msk.f32.vlgmr.msra.gmra.mrb[20].mxu0 %vm331_vm3, %v2004_v52  ;;  %v1072_v53 = vpop.permute.xlu1 %1071 }
0x114b   :  { %1077 = vst.msk [vmem:[#allocation2 + $0x8] sm:$0xff] %vm1075_vm6, %v1072_v53  ;;  %v1671_v54 = vpop.permute.xlu0 %1670  ;;  %2467 = vmatprep.mubr.msk.f32.mxu0 %vm2775_vm7, %v2770_v0 }
0x114c   :  { %1676 = vst.msk [vmem:[#allocation2 + $0x10] sm:$0xff] %vm649_vm4, %v1671_v54 }
0x114e   :  { %v1673_v55 = vpop.permute.xlu1 %1672 }
0x114f   :  { %1677 = vst.msk [vmem:[#allocation2 + $0x18] sm:$0xff] %vm649_vm4, %v1673_v55  ;;  %v1883_v56 = vpop.permute.xlu0 %1882  ;;  %v2102_v58 = vld [vmem:[#allocation2] sm:$0xff] }
0x1150   :  { %1888 = vst.msk [vmem:[#allocation2 + $0x10] sm:$0xff] %vm862_vm5, %v1883_v56 }
0x1152   :  { %v1885_v57 = vpop.permute.xlu1 %1884  ;;  %v2103_v59 = vld [vmem:[#allocation2 + $0x8] sm:$0xff] }
0x1153   :  { %1889 = vst.msk [vmem:[#allocation2 + $0x18] sm:$0xff] %vm862_vm5, %v1885_v57  ;;  %v2551_v60 = vpack.c.bf16 %v2103_v59, %v2102_v58 }
0x1155   :  { %2552 = vmatpush3.bf16.xpose.msra.mxu0 %v2551_v60 }
0x1156   :  { %2553 = vmatprep.subr.bf16.mxu0 %v2774_v49 }
0x121d   :  { %v2458_v61 = vpop.f32.mrb[20].mxu0 }
0x121e   :  { %2096 = vrot.lane.b32.xlu1 %v2458_v61, %s2771_s1  ;;  %v2083_v62 = vpop.f32.mrb[21].mxu0 }
0x121f   :  { %2094 = vrot.lane.b32.xlu0 %v2083_v62, %s2771_s1 }
0x1223   :  { %2108 = vperm.xlu0 %2629, %v48_v63  }
0x1290   :  { %v2097_v5 = vpop.permute.xlu1 %2096 }
0x1291   :  { %2101 = vst.msk [vmem:[#allocation2 + $0x18] sm:$0xff] %vm1075_vm6, %v2097_v5  ;;  %v2095_v6 = vpop.permute.xlu0 %2094 }
0x1292   :  { %2100 = vst.msk [vmem:[#allocation2 + $0x10] sm:$0xff] %vm1075_vm6, %v2095_v6 }
0x1298   :  { %v2105_v8 = vld [vmem:[#allocation2 + $0x18] sm:$0xff] }
0x1299   :  { %v2104_v0 = vld [vmem:[#allocation2 + $0x10] sm:$0xff] }
0x129a   :  { %v2554_v35 = vpack.c.bf16 %v2105_v8, %v2104_v0 }
0x129c   :  { %2555 = vmatpush3.bf16.xpose.msra.mxu0 %v2554_v35 }
0x12a2   :  { %v2109_v31 = vpop.permute.xlu0 %2108 }
0x12a3   :  { %2468 = vmatmul.mubr.f32.vlgmr.msra.gmra.mrb[22].mxu0 %v47_v10 }
0x1376   :  { %v2177_v11 = vpop.f32.mrb[22].mxu0 }
0x1377   :  { %v2178_v12 = vadd.f32 %v2177_v11, %v2109_v31  ;;  %v2469_v14 = vpop.f32.mrb[23].mxu0 }
0x1379   :  { %2181 = vst.msk [vmem:[#allocation8] sm:$0xff] %vm331_vm3, %v2178_v12  ;;  %2183 = vrot.lane.b32.xlu1 %v2178_v12, %s2777_s3 }
0x13eb   :  { %v2184_v15 = vpop.permute.xlu1 %2183 }
0x13ec   :  { %2187 = vst.msk [vmem:[#allocation8 + $0x8] sm:$0xff] %vm331_vm3, %v2184_v15 }
0x13ed   :  { %2749 = shalt.err (!%p2746_p6)
}
0x13ee   :  { %s2750_s24 = scalar_lea.hbm %s3107_s4, 256 }
0x13ef   :  { %p2751_p7 = scmp.ne.s32.totalorder %s3107_s4, %s2750_s24  ;;  %p2754_p8 = scmp.lt.u32.totalorder %s2750_s24, %s3107_s4 }
0x13f1   :  { %p2756_p9 = pnand %p2754_p8, %p2751_p7 }
0x13f3   :  { %2759 = shalt.err (!%p2756_p9)
}
0x13f4   :  { %2199 = dma.vmem_to_hbm [thread:$0]  %s2194_s21, 256, %s3107_s4, [#allocation5], %s2767_s25, %s2767_s25, %s2768_s26  }
0x13f5   :  { %2764 = dma.done.wait [#allocation5], 256  }
0x13f6   :  { %2765 = vsyncadd [#allocation5], 4294967040 }
0x13f7   :  { %2203 = vsyncpa [#allocation4], 1 }
0x13f8   :  { %2204 = vsyncpa [#allocation7], 1 }
0x13f9   :  { %2205 = vsyncpa [#allocation5], 1 }

</bundles_post_ra>
